<compile_context>
chip_gen: v7x
topology: tpu7x:2x2x1
jax: 0.10.0
libtpu: 0.0.40
codegen_flags: <defaults>
</compile_context>

<pallas_src>
import jax
import jax.numpy as jnp
from jax.experimental import pallas as pl
from jax.experimental.pallas import tpu as pltpu

_GROUPS = 4  # users packed per output lane-row (4 * k = 128 lanes for k = 32)


def _round_up(x, m):
    return ((x + m - 1) // m) * m


def _cross_attention_kernel(node_ref, kq_ref, e_ref, w_ref, bias_ref, out_ref):
    """One grid step processes _GROUPS * tile_rows users.

    node_ref: (G, R, t*k)   lane-dense neighbor embeddings, group-major
                            (group j, row r  <->  user j*rows_pad + r)
    kq_ref:   (t*k, t)      block-diagonal fused key/query: KQ[n*k+c, n] = kq[c]
    e_ref:    (t, t*k)      neighbor->lane expand matrix:   E[n, n*k+c] = 1
    w_ref:    (G, t*k, G*k) (Wv @ Wu) tiled over neighbors, placed in the
                            lane-column block of its group (zeros elsewhere)
    bias_ref: (1, G*k)      unifyheads bias tiled G times
    out_ref:  (R, G*k)      lane-dense output tile
    """
    acc = jnp.zeros(out_ref.shape, jnp.float32)
    for j in range(node_ref.shape[0]):                   # static unroll over groups
        x = node_ref[j]                                                  # (R, t*k)
        # logits[r, n] = node[r, n, :] . kq   (the k**-0.5 scaling is folded in)
        logits = jnp.dot(x, kq_ref[...], preferred_element_type=jnp.float32)  # (R, t)
        # numerically-stable softmax over the t neighbors
        m = jnp.max(logits, axis=-1, keepdims=True)
        p = jnp.exp(logits - m)
        denom = jnp.sum(p, axis=-1, keepdims=True)
        att = p * pl.reciprocal(denom, approx=True)                      # (R, t)
        # broadcast att over each neighbor's k lanes: attx[r, n*k+c] = att[r, n]
        attx = jnp.dot(att, e_ref[...], preferred_element_type=jnp.float32)   # (R, t*k)
        # (sum_n att * node) @ (Wv @ Wu), landing in this group's lane columns
        acc = acc + jnp.dot(x * attx, w_ref[j],
                            preferred_element_type=jnp.float32)          # (R, G*k)
    out_ref[...] = acc + bias_ref[...]


def cross_attention(node1, u_rep, params, heads=1, max_tile_rows=1024):
    """Pallas implementation of CrossAttention.forward (heads=1).

    node1: (b, t, k) float32, u_rep: (k,) float32.  Returns (b, k) float32.
    `max_tile_rows` is counted in grouped rows (one grouped row = _GROUPS users);
    the default of 1024 keeps the double-buffered working set ~10 MiB, under the
    16 MiB v5e scoped-VMEM default (32 MiB on v6e/v7x).
    """
    assert heads == 1, ("heads>1 path in the reference module reinterprets "
                        "memory; only heads=1 supported")
    b, t, k = node1.shape
    g = _GROUPS
    tk = t * k
    gk = g * k
    f32 = jnp.float32

    node_flat = node1.reshape(b, tk).astype(f32)       # lane-dense (b, 256)
    wq = params["wq"].astype(f32)
    wk = params["wk"].astype(f32)
    wv = params["wv"].astype(f32)
    wu = params["wu"].astype(f32)
    bu = params["bu"].reshape(1, k).astype(f32)
    u = u_rep.astype(f32)

    # --- fused constants (built once, resident in VMEM) -----------------------
    # logits[b, n] = (node1[b,n,:] @ wk) . (u @ wq) / sqrt(k)
    #             =  node1[b,n,:] @ (wk @ (u @ wq)) / sqrt(k)
    kq_vec = (wk @ (u @ wq)) * (1.0 / float(k) ** 0.5)                    # (k,)
    kq_mat = jnp.kron(jnp.eye(t, dtype=f32), kq_vec.reshape(k, 1))        # (tk, t)
    e_mat = jnp.kron(jnp.eye(t, dtype=f32), jnp.ones((1, k), f32))        # (t, tk)
    # out = (sum_n att*node) @ (wv @ wu) + bu  ->  tile wv@wu over neighbors
    w_fused = jnp.tile(wv @ wu, (t, 1))                                   # (tk, k)
    w_grp = jnp.stack([jnp.pad(w_fused, ((0, 0), (j * k, (g - 1 - j) * k)))
                       for j in range(g)])                                # (g, tk, gk)
    bias = jnp.tile(bu, (1, g))                                           # (1, gk)

    # --- batch tiling (in grouped rows; one grouped row = g users) ------------
    rows = -(-b // g)
    if rows <= 8:
        tile_rows = 8                      # tiny batch: one small tile
        num_tiles = 1
    else:
        # aim for >= 2 grid steps so v7x's two TensorCores both get work,
        # capped so the double-buffered node tile stays VMEM-friendly.
        tile_rows = min(max_tile_rows, _round_up(-(-rows // 2), 8))
        num_tiles = -(-rows // tile_rows)
    rows_pad = num_tiles * tile_rows
    b_pad = g * rows_pad
    if b_pad != b:
        # zero rows -> uniform softmax over zero values -> output = bias; sliced off.
        node_flat = jnp.pad(node_flat, ((0, b_pad - b), (0, 0)))
    node_grp = node_flat.reshape(g, rows_pad, tk)       # user u = j*rows_pad + r

    out = pl.pallas_call(
        _cross_attention_kernel,
        out_shape=jax.ShapeDtypeStruct((rows_pad, gk), f32),
        grid=(num_tiles,),
        in_specs=[
            pl.BlockSpec((g, tile_rows, tk), lambda i: (0, i, 0)),  # node tile
            pl.BlockSpec((tk, t), lambda i: (0, 0)),                # KQ (resident)
            pl.BlockSpec((t, tk), lambda i: (0, 0)),                # E (resident)
            pl.BlockSpec((g, tk, gk), lambda i: (0, 0, 0)),         # fused W (resident)
            pl.BlockSpec((1, gk), lambda i: (0, 0)),                # bias (resident)
        ],
        out_specs=pl.BlockSpec((tile_rows, gk), lambda i: (i, 0)),  # lane-dense tile
        compiler_params=pltpu.CompilerParams(
            dimension_semantics=("parallel",)),
    )(node_grp, kq_mat, e_mat, w_grp, bias)

    # un-group: (rows_pad, g, k) -> (g, rows_pad, k) -> (b_pad, k); cheap (output only)
    out = out.reshape(rows_pad, g, k).transpose(1, 0, 2).reshape(b_pad, k)
    return out[:b]


def cross_attention_reference(node1, u_rep, params):
    """Pure-JAX reference (heads=1), mirrors the (unfused) PyTorch math."""
    b, t, k = node1.shape
    scale = 1.0 / (k ** 0.25)
    q = (u_rep @ params["wq"]) * scale                       # (k,)
    keys = (node1 @ params["wk"]) * scale                    # (b, t, k)
    vals = node1 @ params["wv"]                              # (b, t, k)
    logits = jnp.einsum("k,btk->bt", q, keys)                # (b, t)
    att = jax.nn.softmax(logits, axis=-1)
    ctx = jnp.einsum("bt,btk->bk", att, vals)                # (b, k)
    return ctx @ params["wu"] + params["bu"]


def init_params(key, embed_dim, heads=1):
    """Deterministic nn.Linear-style init (uniform in +-1/sqrt(fan_in)).

    Weights stored transposed, shape (in_features, out_features), so y = x @ W.
    """
    k = embed_dim
    hk = heads * k
    ks = jax.random.split(key, 5)
    bnd_k = 1.0 / jnp.sqrt(jnp.float32(k))
    bnd_hk = 1.0 / jnp.sqrt(jnp.float32(hk))
    return {
        "wk": jax.random.uniform(ks[0], (k, hk), jnp.float32, -bnd_k, bnd_k),
        "wq": jax.random.uniform(ks[1], (k, hk), jnp.float32, -bnd_k, bnd_k),
        "wv": jax.random.uniform(ks[2], (k, hk), jnp.float32, -bnd_k, bnd_k),
        "wu": jax.random.uniform(ks[3], (hk, k), jnp.float32, -bnd_hk, bnd_hk),
        "bu": jax.random.uniform(ks[4], (k,), jnp.float32, -bnd_hk, bnd_hk),
    }


if __name__ == "__main__":
    embed_dim = 32      # k
    heads = 1
    b, t = 2, 8         # batch, number of neighbors
    num_neighs = t      # unused by the forward pass (matches PyTorch)

    root = jax.random.PRNGKey(0)
    k_par, k_node, k_u = jax.random.split(root, 3)
    params = init_params(k_par, embed_dim, heads)
    node1 = jax.random.normal(k_node, (b, t, embed_dim), dtype=jnp.float32)
    u_rep = jax.random.normal(k_u, (embed_dim,), dtype=jnp.float32)

    out = cross_attention(node1, u_rep, params, heads=heads)
    out = jax.block_until_ready(out)

    ref = cross_attention_reference(node1, u_rep, params)
    assert out.shape == (b, embed_dim), out.shape
    # Tolerance covers the exact-math re-associations (q/k and Wv@Wu fusion)
    # plus the approximate EUP reciprocal used for the softmax normalization.
    assert jnp.allclose(out, ref, atol=5e-3, rtol=5e-3), (
        f"max abs err = {jnp.max(jnp.abs(out - ref))}")

    print("KERNEL_OK")
</pallas_src>

<mosaic_0001>
module attributes {stable_mosaic.version = 11 : i64} {
  func.func @_cross_attention_kernel(%arg0: i32, %arg1: memref<4x8x256xf32, #tpu.memory_space<vmem>>, %arg2: memref<256x8xf32, #tpu.memory_space<vmem>>, %arg3: memref<8x256xf32, #tpu.memory_space<vmem>>, %arg4: memref<4x256x128xf32, #tpu.memory_space<vmem>>, %arg5: memref<1x128xf32, #tpu.memory_space<vmem>>, %arg6: memref<8x128xf32, #tpu.memory_space<vmem>>) attributes {dimension_semantics = [#tpu.dimension_semantics<parallel>], iteration_bounds = array<i64: 1>, scalar_prefetch = 0 : i64, scratch_operands = 0 : i64, tpu.core_type = #tpu.core_type<tc>, window_params = [{transform_indices = @transform_0, window_bounds = array<i64: 4, 8, 256>}, {pipeline_mode = #tpu.pipeline_mode<synchronous>, transform_indices = @transform_1, window_bounds = array<i64: 256, 8>}, {pipeline_mode = #tpu.pipeline_mode<synchronous>, transform_indices = @transform_2, window_bounds = array<i64: 8, 256>}, {pipeline_mode = #tpu.pipeline_mode<synchronous>, transform_indices = @transform_3, window_bounds = array<i64: 4, 256, 128>}, {pipeline_mode = #tpu.pipeline_mode<synchronous>, transform_indices = @transform_4, window_bounds = array<i64: 1, 128>}, {transform_indices = @transform_5, window_bounds = array<i64: 8, 128>}]} {
    %cst = arith.constant 0.000000e+00 : f32
    %0 = vector.broadcast %cst : f32 to vector<8x128xf32>
    %c0 = arith.constant 0 : index
    %c0_0 = arith.constant 0 : index
    %c0_1 = arith.constant 0 : index
    %1 = vector.load %arg1[%c0, %c0_0, %c0_1] : memref<4x8x256xf32, #tpu.memory_space<vmem>>, vector<1x8x256xf32>
    %2 = vector.shape_cast %1 : vector<1x8x256xf32> to vector<8x256xf32>
    %c0_2 = arith.constant 0 : index
    %c0_3 = arith.constant 0 : index
    %3 = vector.load %arg2[%c0_2, %c0_3] : memref<256x8xf32, #tpu.memory_space<vmem>>, vector<256x8xf32>
    %cst_4 = arith.constant dense<0.000000e+00> : vector<8x8xf32>
    %4 = tpu.matmul %2, %3, %cst_4 {dimension_numbers = #tpu.dot_dimension_numbers<[1], [0], [0], [1], [0, 0, 1, 1], [], []>} : vector<8x256xf32>, vector<256x8xf32>, vector<8x8xf32> -> vector<8x8xf32>
    %cst_5 = arith.constant dense<0xFF800000> : vector<8xf32>
    %5 = vector.multi_reduction <maximumf>, %4, %cst_5 [1] : vector<8x8xf32> to vector<8xf32>
    %6 = vector.shape_cast %5 : vector<8xf32> to vector<8x1xf32>
    %7 = vector.broadcast %6 : vector<8x1xf32> to vector<8x8xf32>
    %8 = arith.subf %4, %7 : vector<8x8xf32>
    %9 = math.exp %8 : vector<8x8xf32>
    %cst_6 = arith.constant dense<0.000000e+00> : vector<8xf32>
    %10 = vector.multi_reduction <add>, %9, %cst_6 [1] : vector<8x8xf32> to vector<8xf32>
    %11 = vector.shape_cast %10 : vector<8xf32> to vector<8x1xf32>
    %12 = tpu.reciprocal %11 {approx = true} : vector<8x1xf32> -> vector<8x1xf32>
    %13 = vector.broadcast %12 : vector<8x1xf32> to vector<8x8xf32>
    %14 = arith.mulf %9, %13 : vector<8x8xf32>
    %c0_7 = arith.constant 0 : index
    %c0_8 = arith.constant 0 : index
    %15 = vector.load %arg3[%c0_7, %c0_8] : memref<8x256xf32, #tpu.memory_space<vmem>>, vector<8x256xf32>
    %cst_9 = arith.constant dense<0.000000e+00> : vector<8x256xf32>
    %16 = tpu.matmul %14, %15, %cst_9 {dimension_numbers = #tpu.dot_dimension_numbers<[1], [0], [0], [1], [0, 0, 1, 1], [], []>} : vector<8x8xf32>, vector<8x256xf32>, vector<8x256xf32> -> vector<8x256xf32>
    %17 = arith.mulf %2, %16 : vector<8x256xf32>
    %c0_10 = arith.constant 0 : index
    %c0_11 = arith.constant 0 : index
    %c0_12 = arith.constant 0 : index
    %18 = vector.load %arg4[%c0_10, %c0_11, %c0_12] : memref<4x256x128xf32, #tpu.memory_space<vmem>>, vector<1x256x128xf32>
    %19 = vector.shape_cast %18 : vector<1x256x128xf32> to vector<256x128xf32>
    %cst_13 = arith.constant dense<0.000000e+00> : vector<8x128xf32>
    %20 = tpu.matmul %17, %19, %cst_13 {dimension_numbers = #tpu.dot_dimension_numbers<[1], [0], [0], [1], [0, 0, 1, 1], [], []>} : vector<8x256xf32>, vector<256x128xf32>, vector<8x128xf32> -> vector<8x128xf32>
    %21 = arith.addf %0, %20 : vector<8x128xf32>
    %c1 = arith.constant 1 : index
    %c0_14 = arith.constant 0 : index
    %c0_15 = arith.constant 0 : index
    %22 = vector.load %arg1[%c1, %c0_14, %c0_15] : memref<4x8x256xf32, #tpu.memory_space<vmem>>, vector<1x8x256xf32>
    %23 = vector.shape_cast %22 : vector<1x8x256xf32> to vector<8x256xf32>
    %c0_16 = arith.constant 0 : index
    %c0_17 = arith.constant 0 : index
    %24 = vector.load %arg2[%c0_16, %c0_17] : memref<256x8xf32, #tpu.memory_space<vmem>>, vector<256x8xf32>
    %cst_18 = arith.constant dense<0.000000e+00> : vector<8x8xf32>
    %25 = tpu.matmul %23, %24, %cst_18 {dimension_numbers = #tpu.dot_dimension_numbers<[1], [0], [0], [1], [0, 0, 1, 1], [], []>} : vector<8x256xf32>, vector<256x8xf32>, vector<8x8xf32> -> vector<8x8xf32>
    %cst_19 = arith.constant dense<0xFF800000> : vector<8xf32>
    %26 = vector.multi_reduction <maximumf>, %25, %cst_19 [1] : vector<8x8xf32> to vector<8xf32>
    %27 = vector.shape_cast %26 : vector<8xf32> to vector<8x1xf32>
    %28 = vector.broadcast %27 : vector<8x1xf32> to vector<8x8xf32>
    %29 = arith.subf %25, %28 : vector<8x8xf32>
    %30 = math.exp %29 : vector<8x8xf32>
    %cst_20 = arith.constant dense<0.000000e+00> : vector<8xf32>
    %31 = vector.multi_reduction <add>, %30, %cst_20 [1] : vector<8x8xf32> to vector<8xf32>
    %32 = vector.shape_cast %31 : vector<8xf32> to vector<8x1xf32>
    %33 = tpu.reciprocal %32 {approx = true} : vector<8x1xf32> -> vector<8x1xf32>
    %34 = vector.broadcast %33 : vector<8x1xf32> to vector<8x8xf32>
    %35 = arith.mulf %30, %34 : vector<8x8xf32>
    %c0_21 = arith.constant 0 : index
    %c0_22 = arith.constant 0 : index
    %36 = vector.load %arg3[%c0_21, %c0_22] : memref<8x256xf32, #tpu.memory_space<vmem>>, vector<8x256xf32>
    %cst_23 = arith.constant dense<0.000000e+00> : vector<8x256xf32>
    %37 = tpu.matmul %35, %36, %cst_23 {dimension_numbers = #tpu.dot_dimension_numbers<[1], [0], [0], [1], [0, 0, 1, 1], [], []>} : vector<8x8xf32>, vector<8x256xf32>, vector<8x256xf32> -> vector<8x256xf32>
    %38 = arith.mulf %23, %37 : vector<8x256xf32>
    %c1_24 = arith.constant 1 : index
    %c0_25 = arith.constant 0 : index
    %c0_26 = arith.constant 0 : index
    %39 = vector.load %arg4[%c1_24, %c0_25, %c0_26] : memref<4x256x128xf32, #tpu.memory_space<vmem>>, vector<1x256x128xf32>
    %40 = vector.shape_cast %39 : vector<1x256x128xf32> to vector<256x128xf32>
    %cst_27 = arith.constant dense<0.000000e+00> : vector<8x128xf32>
    %41 = tpu.matmul %38, %40, %cst_27 {dimension_numbers = #tpu.dot_dimension_numbers<[1], [0], [0], [1], [0, 0, 1, 1], [], []>} : vector<8x256xf32>, vector<256x128xf32>, vector<8x128xf32> -> vector<8x128xf32>
    %42 = arith.addf %21, %41 : vector<8x128xf32>
    %c2 = arith.constant 2 : index
    %c0_28 = arith.constant 0 : index
    %c0_29 = arith.constant 0 : index
    %43 = vector.load %arg1[%c2, %c0_28, %c0_29] : memref<4x8x256xf32, #tpu.memory_space<vmem>>, vector<1x8x256xf32>
    %44 = vector.shape_cast %43 : vector<1x8x256xf32> to vector<8x256xf32>
    %c0_30 = arith.constant 0 : index
    %c0_31 = arith.constant 0 : index
    %45 = vector.load %arg2[%c0_30, %c0_31] : memref<256x8xf32, #tpu.memory_space<vmem>>, vector<256x8xf32>
    %cst_32 = arith.constant dense<0.000000e+00> : vector<8x8xf32>
    %46 = tpu.matmul %44, %45, %cst_32 {dimension_numbers = #tpu.dot_dimension_numbers<[1], [0], [0], [1], [0, 0, 1, 1], [], []>} : vector<8x256xf32>, vector<256x8xf32>, vector<8x8xf32> -> vector<8x8xf32>
    %cst_33 = arith.constant dense<0xFF800000> : vector<8xf32>
    %47 = vector.multi_reduction <maximumf>, %46, %cst_33 [1] : vector<8x8xf32> to vector<8xf32>
    %48 = vector.shape_cast %47 : vector<8xf32> to vector<8x1xf32>
    %49 = vector.broadcast %48 : vector<8x1xf32> to vector<8x8xf32>
    %50 = arith.subf %46, %49 : vector<8x8xf32>
    %51 = math.exp %50 : vector<8x8xf32>
    %cst_34 = arith.constant dense<0.000000e+00> : vector<8xf32>
    %52 = vector.multi_reduction <add>, %51, %cst_34 [1] : vector<8x8xf32> to vector<8xf32>
    %53 = vector.shape_cast %52 : vector<8xf32> to vector<8x1xf32>
    %54 = tpu.reciprocal %53 {approx = true} : vector<8x1xf32> -> vector<8x1xf32>
    %55 = vector.broadcast %54 : vector<8x1xf32> to vector<8x8xf32>
    %56 = arith.mulf %51, %55 : vector<8x8xf32>
    %c0_35 = arith.constant 0 : index
    %c0_36 = arith.constant 0 : index
    %57 = vector.load %arg3[%c0_35, %c0_36] : memref<8x256xf32, #tpu.memory_space<vmem>>, vector<8x256xf32>
    %cst_37 = arith.constant dense<0.000000e+00> : vector<8x256xf32>
    %58 = tpu.matmul %56, %57, %cst_37 {dimension_numbers = #tpu.dot_dimension_numbers<[1], [0], [0], [1], [0, 0, 1, 1], [], []>} : vector<8x8xf32>, vector<8x256xf32>, vector<8x256xf32> -> vector<8x256xf32>
    %59 = arith.mulf %44, %58 : vector<8x256xf32>
    %c2_38 = arith.constant 2 : index
    %c0_39 = arith.constant 0 : index
    %c0_40 = arith.constant 0 : index
    %60 = vector.load %arg4[%c2_38, %c0_39, %c0_40] : memref<4x256x128xf32, #tpu.memory_space<vmem>>, vector<1x256x128xf32>
    %61 = vector.shape_cast %60 : vector<1x256x128xf32> to vector<256x128xf32>
    %cst_41 = arith.constant dense<0.000000e+00> : vector<8x128xf32>
    %62 = tpu.matmul %59, %61, %cst_41 {dimension_numbers = #tpu.dot_dimension_numbers<[1], [0], [0], [1], [0, 0, 1, 1], [], []>} : vector<8x256xf32>, vector<256x128xf32>, vector<8x128xf32> -> vector<8x128xf32>
    %63 = arith.addf %42, %62 : vector<8x128xf32>
    %c3 = arith.constant 3 : index
    %c0_42 = arith.constant 0 : index
    %c0_43 = arith.constant 0 : index
    %64 = vector.load %arg1[%c3, %c0_42, %c0_43] : memref<4x8x256xf32, #tpu.memory_space<vmem>>, vector<1x8x256xf32>
    %65 = vector.shape_cast %64 : vector<1x8x256xf32> to vector<8x256xf32>
    %c0_44 = arith.constant 0 : index
    %c0_45 = arith.constant 0 : index
    %66 = vector.load %arg2[%c0_44, %c0_45] : memref<256x8xf32, #tpu.memory_space<vmem>>, vector<256x8xf32>
    %cst_46 = arith.constant dense<0.000000e+00> : vector<8x8xf32>
    %67 = tpu.matmul %65, %66, %cst_46 {dimension_numbers = #tpu.dot_dimension_numbers<[1], [0], [0], [1], [0, 0, 1, 1], [], []>} : vector<8x256xf32>, vector<256x8xf32>, vector<8x8xf32> -> vector<8x8xf32>
    %cst_47 = arith.constant dense<0xFF800000> : vector<8xf32>
    %68 = vector.multi_reduction <maximumf>, %67, %cst_47 [1] : vector<8x8xf32> to vector<8xf32>
    %69 = vector.shape_cast %68 : vector<8xf32> to vector<8x1xf32>
    %70 = vector.broadcast %69 : vector<8x1xf32> to vector<8x8xf32>
    %71 = arith.subf %67, %70 : vector<8x8xf32>
    %72 = math.exp %71 : vector<8x8xf32>
    %cst_48 = arith.constant dense<0.000000e+00> : vector<8xf32>
    %73 = vector.multi_reduction <add>, %72, %cst_48 [1] : vector<8x8xf32> to vector<8xf32>
    %74 = vector.shape_cast %73 : vector<8xf32> to vector<8x1xf32>
    %75 = tpu.reciprocal %74 {approx = true} : vector<8x1xf32> -> vector<8x1xf32>
    %76 = vector.broadcast %75 : vector<8x1xf32> to vector<8x8xf32>
    %77 = arith.mulf %72, %76 : vector<8x8xf32>
    %c0_49 = arith.constant 0 : index
    %c0_50 = arith.constant 0 : index
    %78 = vector.load %arg3[%c0_49, %c0_50] : memref<8x256xf32, #tpu.memory_space<vmem>>, vector<8x256xf32>
    %cst_51 = arith.constant dense<0.000000e+00> : vector<8x256xf32>
    %79 = tpu.matmul %77, %78, %cst_51 {dimension_numbers = #tpu.dot_dimension_numbers<[1], [0], [0], [1], [0, 0, 1, 1], [], []>} : vector<8x8xf32>, vector<8x256xf32>, vector<8x256xf32> -> vector<8x256xf32>
    %80 = arith.mulf %65, %79 : vector<8x256xf32>
    %c3_52 = arith.constant 3 : index
    %c0_53 = arith.constant 0 : index
    %c0_54 = arith.constant 0 : index
    %81 = vector.load %arg4[%c3_52, %c0_53, %c0_54] : memref<4x256x128xf32, #tpu.memory_space<vmem>>, vector<1x256x128xf32>
    %82 = vector.shape_cast %81 : vector<1x256x128xf32> to vector<256x128xf32>
    %cst_55 = arith.constant dense<0.000000e+00> : vector<8x128xf32>
    %83 = tpu.matmul %80, %82, %cst_55 {dimension_numbers = #tpu.dot_dimension_numbers<[1], [0], [0], [1], [0, 0, 1, 1], [], []>} : vector<8x256xf32>, vector<256x128xf32>, vector<8x128xf32> -> vector<8x128xf32>
    %84 = arith.addf %63, %83 : vector<8x128xf32>
    %c0_56 = arith.constant 0 : index
    %c0_57 = arith.constant 0 : index
    %85 = vector.load %arg5[%c0_56, %c0_57] : memref<1x128xf32, #tpu.memory_space<vmem>>, vector<1x128xf32>
    %86 = vector.broadcast %85 : vector<1x128xf32> to vector<8x128xf32>
    %87 = arith.addf %84, %86 : vector<8x128xf32>
    %c0_58 = arith.constant 0 : index
    %c0_59 = arith.constant 0 : index
    %88 = vector.load %arg6[%c0_58, %c0_59] : memref<8x128xf32, #tpu.memory_space<vmem>>, vector<8x128xf32>
    tpu.vector_store %arg6[%c0_58, %c0_59], %87 {strides = array<i32>} : memref<8x128xf32, #tpu.memory_space<vmem>>, vector<8x128xf32>,
    return
  }
  func.func @transform_0(%arg0: i32) -> (i32, i32, i32) {
    %c0_i32 = arith.constant 0 : i32
    %c0_i32_0 = arith.constant 0 : i32
    %c0_i32_1 = arith.constant 0 : i32
    return %c0_i32, %arg0, %c0_i32_0 : i32, i32, i32
  }
  func.func @transform_1(%arg0: i32) -> (i32, i32) {
    %c0_i32 = arith.constant 0 : i32
    %c0_i32_0 = arith.constant 0 : i32
    %c0_i32_1 = arith.constant 0 : i32
    return %c0_i32, %c0_i32_0 : i32, i32
  }
  func.func @transform_2(%arg0: i32) -> (i32, i32) {
    %c0_i32 = arith.constant 0 : i32
    %c0_i32_0 = arith.constant 0 : i32
    %c0_i32_1 = arith.constant 0 : i32
    return %c0_i32, %c0_i32_0 : i32, i32
  }
  func.func @transform_3(%arg0: i32) -> (i32, i32, i32) {
    %c0_i32 = arith.constant 0 : i32
    %c0_i32_0 = arith.constant 0 : i32
    %c0_i32_1 = arith.constant 0 : i32
    %c0_i32_2 = arith.constant 0 : i32
    return %c0_i32, %c0_i32_0, %c0_i32_1 : i32, i32, i32
  }
  func.func @transform_4(%arg0: i32) -> (i32, i32) {
    %c0_i32 = arith.constant 0 : i32
    %c0_i32_0 = arith.constant 0 : i32
    %c0_i32_1 = arith.constant 0 : i32
    return %c0_i32, %c0_i32_0 : i32, i32
  }
  func.func @transform_5(%arg0: i32) -> (i32, i32) {
    %c0_i32 = arith.constant 0 : i32
    %c0_i32_0 = arith.constant 0 : i32
    return %arg0, %c0_i32 : i32, i32
  }
}

</mosaic_0001>

<bundles_post_ra>
// kernel: tpu_custom_call.1
= control target key start
LH: loop header
LB: loop body
LE: loop exit
PB: predicated region body
PF: predicated region fallthrough
CT: control target
= control target key end

     0   :  { %10 = vsyncpa [#allocation3], 0  ;;  %s2120_s0 = inlined_call_operand.vmem [shape: f32[4,8,256], index: 0, kind: input, shape index: {}]   ;;  %s2121_s1 = inlined_call_operand.vmem [shape: f32[256,8], index: 1, kind: input, shape index: {}]   ;;  %s2122_s2 = inlined_call_operand.vmem [shape: f32[8,256], index: 2, kind: input, shape index: {}]   ;;  %s2123_s3 = inlined_call_operand.hbm [shape: f32[4,256,128], index: 3, kind: input, shape index: {}]   ;;  %s2124_s4 = inlined_call_operand.vmem [shape: f32[1,128], index: 4, kind: input, shape index: {}]   ;;  %s2125_s5 = inlined_call_operand.hbm [shape: f32[8,128], index: 5, kind: output, shape index: {}]  }
   0x1   :  { %11 = vsyncpa [#allocation4], 0  ;;  %s1762_s18 = smov [#allocation2]   ;;  %s1714_s22 = scalar_lea.hbm %s2123_s3, 16384 }
   0x2   :  { %s23_s19 = sshll.u32 %s1762_s18, 4  ;;  %p1715_p0 = scmp.ne.s32.totalorder %s2123_s3, %s1714_s22  ;;  %s24_s19 = int_to_ptr.vmem [resolvable:$true] %s23_s19 }
   0x3   :  { %p1718_p1 = scmp.lt.u32.totalorder %s1714_s22, %s2123_s3 }
   0x5   :  { %p1720_p2 = pnand %p1718_p1, %p1715_p0 }
   0x7   :  { %1723 = shalt.err (!%p1720_p2)
}
   0x8   :  { %s1724_s27 = scalar_lea.vmem %s24_s19, 16384  ;;  %p1729_p4 = scmp.lt.s32.totalorder %s24_s19, %s24_s19 }
   0x9   :  { %p1725_p3 = scmp.ne.s32.totalorder %s24_s19, %s1724_s27  ;;  %p1730_p5 = scmp.lt.s32.totalorder %s1724_s27, %s1724_s27 }
   0xb   :  { %p1731_p6 = por %p1730_p5, %p1729_p4 }
   0xd   :  { %p1732_p7 = pnand %p1731_p6, %p1725_p3 }
   0xf   :  { %1735 = shalt.err (!%p1732_p7)
}
  0x10   :  { %s1763_s28 = smov 128   ;;  %s1764_s29 = smov 8  }
  0x11   :  { %29 = dma.hbm_to_vmem [thread:$0]  %s2123_s3, 16384, %s24_s19, [#allocation3], %s1763_s28, %s1763_s28, %s1764_s29  }
  0x12   :  { %1758 = dma.done.wait [#allocation3], 16384  }
  0x13   :  { %1759 = vsyncadd [#allocation3], 4294950912  ;;  %v53_v0 = vld [vmem:[%s2121_s1 + $0x80] sm:$0xff]  ;;  %v54_v1 = vld [vmem:[%s2121_s1 + $0x88] sm:$0xff]  ;;  %vm139_vm0 = vcmask 64512   ;;  %v1765_v61 = vmov 0.0  }
  0x14   :  { %v37_v2 = vld [vmem:[%s2121_s1] sm:$0xff]  ;;  %v1818_v3 = vpack.c.bf16 %v54_v1, %v53_v0  ;;  %v38_v4 = vld [vmem:[%s2121_s1 + $0x8] sm:$0xff]  ;;  %v55_v5 = vld [vmem:[%s2121_s1 + $0x90] sm:$0xff]  ;;  %220 = vmatprep.mubr.f32.mxu1 %v1765_v61  ;;  %s1766_s12 = smov [#allocation5]  }
  0x15   :  { %v56_v6 = vld [vmem:[%s2121_s1 + $0x98] sm:$0xff]  ;;  %v1829_v7 = vpack.c.bf16 %v38_v4, %v37_v2  ;;  %v39_v9 = vld [vmem:[%s2121_s1 + $0x10] sm:$0xff]  ;;  %v57_v11 = vld [vmem:[%s2121_s1 + $0xa0] sm:$0xff]  ;;  %s1137_s13 = sshll.u32 %s1766_s12, 4  ;;  %s1138_s13 = int_to_ptr.vmem [resolvable:$true] %s1137_s13 }
  0x16   :  { %v1831_v8 = vpack.c.bf16 %v56_v6, %v55_v5  ;;  %v40_v10 = vld [vmem:[%s2121_s1 + $0x18] sm:$0xff]  ;;  %1438 = vmatprep.subr.bf16.mxu0 %v1818_v3  ;;  %v58_v12 = vld [vmem:[%s2121_s1 + $0xa8] sm:$0xff]  ;;  %v41_v15 = vld [vmem:[%s2121_s1 + $0x20] sm:$0xff]  ;;  %s1736_s14 = scalar_lea.vmem %s1138_s13, 128  ;;  %p1741_p9 = scmp.lt.s32.totalorder %s1138_s13, %s1138_s13 }
  0x17   :  { %1440 = vmatpush3.bf16.msra.mxu0 %v1829_v7  ;;  %v1847_v13 = vpack.c.bf16 %v40_v10, %v39_v9  ;;  %v1850_v14 = vpack.c.bf16 %v58_v12, %v57_v11  ;;  %v42_v16 = vld [vmem:[%s2121_s1 + $0x28] sm:$0xff]  ;;  %v59_v17 = vld [vmem:[%s2121_s1 + $0xb0] sm:$0xff]  ;;  %v60_v18 = vld [vmem:[%s2121_s1 + $0xb8] sm:$0xff]  ;;  %p1737_p8 = scmp.ne.s32.totalorder %s1138_s13, %s1736_s14  ;;  %p1742_p10 = scmp.lt.s32.totalorder %s1736_s14, %s1736_s14 }
  0x18   :  { %1442 = vmatprep.subr.bf16.mxu0 %v1831_v8  ;;  %v1865_v19 = vpack.c.bf16 %v42_v16, %v41_v15  ;;  %v1868_v20 = vpack.c.bf16 %v60_v18, %v59_v17  ;;  %v43_v21 = vld [vmem:[%s2121_s1 + $0x30] sm:$0xff]  ;;  %v44_v22 = vld [vmem:[%s2121_s1 + $0x38] sm:$0xff]  ;;  %v61_v23 = vld [vmem:[%s2121_s1 + $0xc0] sm:$0xff] }
  0x19   :  { %v62_v24 = vld [vmem:[%s2121_s1 + $0xc8] sm:$0xff]  ;;  %v1889_v26 = vpack.c.bf16 %v44_v22, %v43_v21  ;;  %v45_v28 = vld [vmem:[%s2121_s1 + $0x40] sm:$0xff]  ;;  %v63_v30 = vld [vmem:[%s2121_s1 + $0xd0] sm:$0xff]  ;;  %p1743_p11 = por %p1742_p10, %p1741_p9 }
  0x1a   :  { %v1885_v25 = vld [vmem:[%s2120_s0 + $0x8] sm:$0xff]  ;;  %v1892_v27 = vpack.c.bf16 %v62_v24, %v61_v23  ;;  %v64_v31 = vld [vmem:[%s2121_s1 + $0xd8] sm:$0xff]  ;;  %v47_v34 = vld [vmem:[%s2121_s1 + $0x50] sm:$0xff] }
  0x1b   :  { %1444 = vmatpush3.bf16.msra.mxu0 %v1847_v13  ;;  %133 = vmatprep.mubr.f32.mxu0 %v1885_v25  ;;  %v46_v29 = vld [vmem:[%s2121_s1 + $0x48] sm:$0xff]  ;;  %v1910_v33 = vpack.c.bf16 %v64_v31, %v63_v30  ;;  %v48_v35 = vld [vmem:[%s2121_s1 + $0x58] sm:$0xff]  ;;  %v65_v36 = vld [vmem:[%s2121_s1 + $0xe0] sm:$0xff]  ;;  %p1744_p12 = pnand %p1743_p11, %p1737_p8 }
  0x1c   :  { %1446 = vmatprep.subr.bf16.mxu0 %v1850_v14  ;;  %v1907_v32 = vpack.c.bf16 %v46_v29, %v45_v28  ;;  %v66_v37 = vld [vmem:[%s2121_s1 + $0xe8] sm:$0xff]  ;;  %v1925_v38 = vpack.c.bf16 %v48_v35, %v47_v34  ;;  %v49_v40 = vld [vmem:[%s2121_s1 + $0x60] sm:$0xff]  ;;  %v67_v42 = vld [vmem:[%s2121_s1 + $0xf0] sm:$0xff] }
  0x1d   :  { %v1928_v39 = vpack.c.bf16 %v66_v37, %v65_v36  ;;  %v50_v41 = vld [vmem:[%s2121_s1 + $0x68] sm:$0xff]  ;;  %v68_v43 = vld [vmem:[%s2121_s1 + $0xf8] sm:$0xff]  ;;  %v51_v46 = vld [vmem:[%s2121_s1 + $0x70] sm:$0xff] }
  0x1e   :  { %v1943_v44 = vpack.c.bf16 %v50_v41, %v49_v40  ;;  %v1946_v45 = vpack.c.bf16 %v68_v43, %v67_v42  ;;  %v52_v47 = vld [vmem:[%s2121_s1 + $0x78] sm:$0xff]  ;;  %v1962_v49 = vld [vmem:[%s2120_s0] sm:$0xff]  ;;  %v1973_v59 = vld [vmem:[%s2122_s2 + $0x8] sm:$0xff] }
  0x1f   :  { %1448 = vmatpush3.bf16.msra.mxu0 %v1865_v19  ;;  %v1955_v48 = vpack.c.bf16 %v52_v47, %v51_v46  ;;  %v1978_v60 = vld [vmem:[%s2122_s2] sm:$0xff]  ;;  %156 = vmatprep.subr.mxu1 %v1973_v59  ;;  %v246_v63 = vld [vmem:[#allocation2 + $0x88] sm:$0xff]  ;;  %v247_v4 = vld [vmem:[#allocation2 + $0x90] sm:$0xff] }
  0x20   :  { %1450 = vmatprep.subr.bf16.mxu0 %v1868_v20  ;;  %157 = vmatpush1.msra.mxu1 %v1978_v60  ;;  %v245_v62 = vld [vmem:[#allocation2 + $0x80] sm:$0xff]  ;;  %v230_v2 = vld [vmem:[#allocation2 + $0x8] sm:$0xff]  ;;  %v248_v5 = vld [vmem:[#allocation2 + $0x98] sm:$0xff] }
  0x21   :  { %1470 = vmatprep.subr.bf16.mxu1 %v1818_v3  ;;  %v229_v0 = vld [vmem:[#allocation2] sm:$0xff]  ;;  %v1533_v1 = vpack.c.bf16 %v246_v63, %v245_v62  ;;  %v1537_v9 = vpack.c.bf16 %v248_v5, %v247_v4  ;;  %v231_v10 = vld [vmem:[#allocation2 + $0x10] sm:$0xff]  ;;  %v232_v11 = vld [vmem:[#allocation2 + $0x18] sm:$0xff] }
  0x22   :  { %v1535_v6 = vpack.c.bf16 %v230_v2, %v229_v0  ;;  %v249_v12 = vld [vmem:[#allocation2 + $0xa0] sm:$0xff]  ;;  %v250_v15 = vld [vmem:[#allocation2 + $0xa8] sm:$0xff]  ;;  %v1539_v16 = vpack.c.bf16 %v232_v11, %v231_v10  ;;  %v251_v22 = vld [vmem:[#allocation2 + $0xb0] sm:$0xff] }
  0x23   :  { %1452 = vmatpush3.bf16.msra.mxu0 %v1889_v26  ;;  %v1541_v17 = vpack.c.bf16 %v250_v15, %v249_v12  ;;  %v233_v18 = vld [vmem:[#allocation2 + $0x20] sm:$0xff]  ;;  %v234_v21 = vld [vmem:[#allocation2 + $0x28] sm:$0xff]  ;;  %v252_v23 = vld [vmem:[#allocation2 + $0xb8] sm:$0xff] }
  0x24   :  { %1454 = vmatprep.subr.bf16.mxu0 %v1892_v27  ;;  %v1543_v24 = vpack.c.bf16 %v234_v21, %v233_v18  ;;  %v1545_v28 = vpack.c.bf16 %v252_v23, %v251_v22  ;;  %v235_v29 = vld [vmem:[#allocation2 + $0x30] sm:$0xff]  ;;  %v236_v30 = vld [vmem:[#allocation2 + $0x38] sm:$0xff]  ;;  %v253_v31 = vld [vmem:[#allocation2 + $0xc0] sm:$0xff] }
  0x25   :  { %v254_v34 = vld [vmem:[#allocation2 + $0xc8] sm:$0xff]  ;;  %v1547_v35 = vpack.c.bf16 %v236_v30, %v235_v29  ;;  %v237_v37 = vld [vmem:[#allocation2 + $0x40] sm:$0xff]  ;;  %v255_v41 = vld [vmem:[#allocation2 + $0xd0] sm:$0xff] }
  0x26   :  { %v1549_v36 = vpack.c.bf16 %v254_v34, %v253_v31  ;;  %v238_v40 = vld [vmem:[#allocation2 + $0x48] sm:$0xff]  ;;  %v256_v42 = vld [vmem:[#allocation2 + $0xd8] sm:$0xff]  ;;  %v239_v47 = vld [vmem:[#allocation2 + $0x50] sm:$0xff] }
  0x27   :  { %1456 = vmatpush3.bf16.msra.mxu0 %v1907_v32  ;;  %v1551_v43 = vpack.c.bf16 %v238_v40, %v237_v37  ;;  %v1553_v46 = vpack.c.bf16 %v256_v42, %v255_v41  ;;  %v259_v2 = vld [vmem:[#allocation2 + $0xf0] sm:$0xff]  ;;  %v260_v4 = vld [vmem:[#allocation2 + $0xf8] sm:$0xff]  ;;  %v438_v34 = vld [vmem:[#allocation2 + $0x180] sm:$0xff] }
  0x28   :  { %1458 = vmatprep.subr.bf16.mxu0 %v1910_v33  ;;  %v1561_v5 = vpack.c.bf16 %v260_v4, %v259_v2  ;;  %v422_v40 = vld [vmem:[#allocation2 + $0x100] sm:$0xff]  ;;  %v423_v41 = vld [vmem:[#allocation2 + $0x108] sm:$0xff]  ;;  %v440_v42 = vld [vmem:[#allocation2 + $0x190] sm:$0xff] }
  0x29   :  { %v445_v2 = vld [vmem:[#allocation2 + $0x1b8] sm:$0xff] }
  0x2b   :  { %1460 = vmatpush3.bf16.msra.mxu0 %v1925_v38 }
  0x2c   :  { %1462 = vmatprep.subr.bf16.mxu0 %v1928_v39 }
  0x2f   :  { %1464 = vmatpush3.bf16.msra.mxu0 %v1943_v44 }
  0x30   :  { %1466 = vmatprep.subr.bf16.mxu0 %v1946_v45 }
  0x33   :  { %1468 = vmatpush3.bf16.msra.mxu0 %v1955_v48 }
  0x34   :  { %1534 = vmatprep.subr.bf16.mxu0 %v1533_v1  ;;  %v1988_v1 = vld [vmem:[%s2120_s0 + $0x18] sm:$0xff] }
  0x36   :  { %134 = vmatmul.mubr.f32.vlgmr.msra.gmra.mrb[0].mxu0 %v1962_v49 }
  0x37   :  { %1536 = vmatpush3.bf16.msra.mxu0 %v1535_v6  ;;  %v243_v6 = vld [vmem:[#allocation2 + $0x70] sm:$0xff] }
  0x38   :  { %1538 = vmatprep.subr.bf16.mxu0 %v1537_v9  ;;  %v244_v9 = vld [vmem:[#allocation2 + $0x78] sm:$0xff] }
  0x39   :  { %v1563_v10 = vpack.c.bf16 %v244_v9, %v243_v6  ;;  %v428_v6 = vld [vmem:[#allocation2 + $0x130] sm:$0xff]  ;;  %v429_v9 = vld [vmem:[#allocation2 + $0x138] sm:$0xff] }
  0x3b   :  { %1540 = vmatpush3.bf16.msra.mxu0 %v1539_v16 }
  0x3c   :  { %1542 = vmatprep.subr.bf16.mxu0 %v1541_v17 }
  0x3f   :  { %1544 = vmatpush3.bf16.msra.mxu0 %v1543_v24 }
  0x40   :  { %1546 = vmatprep.subr.bf16.mxu0 %v1545_v28 }
  0x43   :  { %1548 = vmatpush3.bf16.msra.mxu0 %v1547_v35  ;;  %v439_v35 = vld [vmem:[#allocation2 + $0x188] sm:$0xff] }
  0x44   :  { %1550 = vmatprep.subr.bf16.mxu0 %v1549_v36  ;;  %v1501_v36 = vpack.c.bf16 %v439_v35, %v438_v34  ;;  %v434_v34 = vld [vmem:[#allocation2 + $0x160] sm:$0xff]  ;;  %v435_v35 = vld [vmem:[#allocation2 + $0x168] sm:$0xff] }
  0x47   :  { %1552 = vmatpush3.bf16.msra.mxu0 %v1551_v43  ;;  %v441_v43 = vld [vmem:[#allocation2 + $0x198] sm:$0xff] }
  0x48   :  { %1554 = vmatprep.subr.bf16.mxu0 %v1553_v46 }
 0x109   :  { %v1189_v50 = vpop.f32.mrb[0].mxu0 }
 0x10a   :  { %v1190_v51 = vpop.f32.mrb[1].mxu0 }
 0x10b   :  { %v1191_v52 = vadd.f32 %v1190_v51, %v1189_v50  ;;  %v240_v50 = vld [vmem:[#allocation2 + $0x58] sm:$0xff]  ;;  %v257_v51 = vld [vmem:[#allocation2 + $0xe0] sm:$0xff] }
 0x10d   :  { %v140_v53 = vsel %vm139_vm0, %v1191_v52, -inf }
 0x10e   :  { %141 = vmax.xlane.f32.xlu0 %v140_v53  ;;  %v1555_v53 = vpack.c.bf16 %v240_v50, %v239_v47  ;;  %v1503_v47 = vpack.c.bf16 %v423_v41, %v422_v40  ;;  %v453_v40 = vld [vmem:[#allocation2 + $0x1f8] sm:$0xff] }
 0x110   :  { %1556 = vmatpush3.bf16.msra.mxu0 %v1555_v53  ;;  %v425_v53 = vld [vmem:[#allocation2 + $0x118] sm:$0xff] }
 0x19b   :  { %v142_v54 = vpop.xlane.xlu0 %141 }
 0x19c   :  { %v143_v55 = vsub.f32 %v1191_v52, %v142_v54  ;;  %v258_v52 = vld [vmem:[#allocation2 + $0xe8] sm:$0xff] }
 0x19d   :  { %v1557_v54 = vpack.c.bf16 %v258_v52, %v257_v51  ;;  %v1505_v51 = vpack.c.bf16 %v441_v43, %v440_v42  ;;  %v424_v52 = vld [vmem:[#allocation2 + $0x110] sm:$0xff]  ;;  %v437_v43 = vld [vmem:[#allocation2 + $0x178] sm:$0xff] }
 0x19e   :  { %v144_v56 = vmul.f32 1.442695, %v143_v55  ;;  %v241_v55 = vld [vmem:[#allocation2 + $0x60] sm:$0xff]  ;;  %v436_v42 = vld [vmem:[#allocation2 + $0x170] sm:$0xff] }
 0x19f   :  { %1558 = vmatprep.subr.bf16.mxu0 %v1557_v54  ;;  %v442_v54 = vld [vmem:[#allocation2 + $0x1a0] sm:$0xff] }
 0x1a0   :  { %1698 = vpow2.f32 %v144_v56  ;;  %v242_v56 = vld [vmem:[#allocation2 + $0x68] sm:$0xff] }
 0x1aa   :  { %v1966_v57 = vpop.eup %1698 }
 0x1ab   :  { %v146_v58 = vsel %vm139_vm0, %v1966_v57, 0.0 }
 0x1ac   :  { %147 = vadd.xlane.f32.xlu0 %v146_v58  ;;  %v1559_v58 = vpack.c.bf16 %v242_v56, %v241_v55  ;;  %v443_v55 = vld [vmem:[#allocation2 + $0x1a8] sm:$0xff]  ;;  %v1507_v56 = vpack.c.bf16 %v425_v53, %v424_v52 }
 0x1ad   :  { %v2032_v53 = vld [vmem:[%s2120_s0 + $0x28] sm:$0xff] }
 0x1ae   :  { %1560 = vmatpush3.bf16.msra.mxu0 %v1559_v58  ;;  %v1509_v58 = vpack.c.bf16 %v443_v55, %v442_v54 }
 0x1af   :  { %1562 = vmatprep.subr.bf16.mxu0 %v1561_v5 }
 0x1b2   :  { %1564 = vmatpush3.bf16.msra.mxu0 %v1563_v10  ;;  %v446_v10 = vld [vmem:[#allocation2 + $0x1c0] sm:$0xff] }
 0x1b3   :  { %681 = vmatprep.subr.mxu0 %v1973_v59 }
 0x239   :  { %v148_v62 = vpop.xlane.xlu0 %147 }
 0x23a   :  { %1700 = vrcp.f32 %v148_v62  ;;  %v426_v62 = vld [vmem:[#allocation2 + $0x120] sm:$0xff] }
 0x244   :  { %v1701_v63 = vpop.eup %1700 }
 0x245   :  { %v150_v0 = vmul.f32 %v1701_v63, %v1966_v57  ;;  %v2010_v57 = vld [vmem:[%s2120_s0 + $0x10] sm:$0xff]  ;;  %v427_v63 = vld [vmem:[#allocation2 + $0x128] sm:$0xff] }
 0x246   :  { %v1511_v4 = vpack.c.bf16 %v427_v63, %v426_v62 }
 0x247   :  { %1146 = vmatmul.mubr.msk.f32.vlgmr.msra.gmra.mrb[0].mxu1 %vm139_vm0, %v150_v0  ;;  %v444_v0 = vld [vmem:[#allocation2 + $0x1b0] sm:$0xff] }
 0x248   :  { %1472 = vmatpush3.bf16.msra.mxu1 %v1829_v7  ;;  %328 = vmatprep.mubr.f32.mxu1 %v1988_v1  ;;  %v1513_v5 = vpack.c.bf16 %v445_v2, %v444_v0  ;;  %v771_v0 = vld [vmem:[#allocation2 + $0x280] sm:$0xff]  ;;  %v772_v2 = vld [vmem:[#allocation2 + $0x288] sm:$0xff] }
 0x249   :  { %1474 = vmatprep.subr.bf16.mxu1 %v1831_v8 }
 0x24c   :  { %1476 = vmatpush3.bf16.msra.mxu1 %v1847_v13 }
 0x24d   :  { %1478 = vmatprep.subr.bf16.mxu1 %v1850_v14 }
 0x250   :  { %1480 = vmatpush3.bf16.msra.mxu1 %v1865_v19 }
 0x251   :  { %1482 = vmatprep.subr.bf16.mxu1 %v1868_v20 }
 0x254   :  { %1484 = vmatpush3.bf16.msra.mxu1 %v1889_v26 }
 0x255   :  { %1486 = vmatprep.subr.bf16.mxu1 %v1892_v27 }
 0x258   :  { %1488 = vmatpush3.bf16.msra.mxu1 %v1907_v32 }
 0x259   :  { %1490 = vmatprep.subr.bf16.mxu1 %v1910_v33 }
 0x25c   :  { %1492 = vmatpush3.bf16.msra.mxu1 %v1925_v38 }
 0x25d   :  { %1494 = vmatprep.subr.bf16.mxu1 %v1928_v39 }
 0x260   :  { %1496 = vmatpush3.bf16.msra.mxu1 %v1943_v44 }
 0x261   :  { %1498 = vmatprep.subr.bf16.mxu1 %v1946_v45 }
 0x264   :  { %1500 = vmatpush3.bf16.msra.mxu1 %v1955_v48 }
 0x265   :  { %348 = vmatprep.subr.mxu1 %v1973_v59 }
 0x267   :  { %329 = vmatmul.mubr.f32.vlgmr.msra.gmra.mrb[2].mxu1 %v2010_v57 }
 0x268   :  { %349 = vmatpush1.msra.mxu1 %v1978_v60  ;;  %412 = vmatprep.mubr.f32.mxu1 %v1765_v61 }
 0x269   :  { %1502 = vmatprep.subr.bf16.mxu1 %v1501_v36  ;;  %v1527_v36 = vpack.c.bf16 %v435_v35, %v434_v34 }
 0x31a   :  { %v222_v11 = vpop.f32.mrb[0].mxu1 }
 0x31b   :  { %v224_v12 = vpop.f32.mrb[1].mxu1  ;;  %v227_v16 = vmul.f32 %v222_v11, %v1962_v49  ;;  %v447_v11 = vld [vmem:[#allocation2 + $0x1c8] sm:$0xff] }
 0x31c   :  { %v228_v15 = vmul.f32 %v224_v12, %v1885_v25  ;;  %v1515_v12 = vpack.c.bf16 %v429_v9, %v428_v6  ;;  %v755_v6 = vld [vmem:[#allocation2 + $0x200] sm:$0xff]  ;;  %v756_v9 = vld [vmem:[#allocation2 + $0x208] sm:$0xff] }
 0x31e   :  { %588 = vmatprep.mubr.f32.mxu0 %v228_v15  ;;  %v1517_v15 = vpack.c.bf16 %v447_v11, %v446_v10  ;;  %v773_v10 = vld [vmem:[#allocation2 + $0x290] sm:$0xff]  ;;  %v774_v11 = vld [vmem:[#allocation2 + $0x298] sm:$0xff] }
 0x31f   :  { %589 = vmatmul.mubr.f32.vlgmr.msra.gmra.mrb[2].mxu0 %v227_v16  ;;  %v430_v16 = vld [vmem:[#allocation2 + $0x140] sm:$0xff] }
 0x320   :  { %682 = vmatpush1.msra.mxu0 %v1978_v60  ;;  %745 = vmatprep.mubr.f32.mxu0 %v1765_v61 }
 0x33a   :  { %v1224_v17 = vpop.f32.mrb[2].mxu1 }
 0x33b   :  { %v1225_v18 = vpop.f32.mrb[3].mxu1 }
 0x33c   :  { %v1226_v21 = vadd.f32 %v1225_v18, %v1224_v17  ;;  %v431_v17 = vld [vmem:[#allocation2 + $0x148] sm:$0xff]  ;;  %v448_v18 = vld [vmem:[#allocation2 + $0x1d0] sm:$0xff] }
 0x33e   :  { %v334_v22 = vsel %vm139_vm0, %v1226_v21, -inf }
 0x33f   :  { %335 = vmax.xlane.f32.xlu1 %v334_v22  ;;  %v1519_v22 = vpack.c.bf16 %v431_v17, %v430_v16  ;;  %v1601_v17 = vpack.c.bf16 %v774_v11, %v773_v10  ;;  %v1037_v11 = vld [vmem:[#allocation2 + $0x390] sm:$0xff] }
 0x3cc   :  { %v336_v23 = vpop.xlane.xlu1 %335 }
 0x3cd   :  { %v337_v24 = vsub.f32 %v1226_v21, %v336_v23  ;;  %v449_v21 = vld [vmem:[#allocation2 + $0x1d8] sm:$0xff] }
 0x3ce   :  { %v1521_v23 = vpack.c.bf16 %v449_v21, %v448_v18  ;;  %v757_v18 = vld [vmem:[#allocation2 + $0x210] sm:$0xff]  ;;  %v758_v21 = vld [vmem:[#allocation2 + $0x218] sm:$0xff] }
 0x3cf   :  { %v338_v28 = vmul.f32 1.442695, %v337_v24  ;;  %v432_v24 = vld [vmem:[#allocation2 + $0x150] sm:$0xff] }
 0x3d1   :  { %1702 = vpow2.f32 %v338_v28  ;;  %v433_v28 = vld [vmem:[#allocation2 + $0x158] sm:$0xff] }
 0x3db   :  { %v1703_v29 = vpop.eup %1702 }
 0x3dc   :  { %v340_v25 = vsel %vm139_vm0, %v1703_v29, 0.0 }
 0x3dd   :  { %341 = vadd.xlane.f32.xlu1 %v340_v25  ;;  %v451_v25 = vld [vmem:[#allocation2 + $0x1e8] sm:$0xff] }
 0x3f2   :  { %v1294_v49 = vpop.f32.mrb[2].mxu0 }
 0x3f3   :  { %v1295_v30 = vpop.f32.mrb[3].mxu0 }
 0x3f4   :  { %v2023_v31 = vadd.f32 %v1295_v30, %v1294_v49  ;;  %v1523_v49 = vpack.c.bf16 %v433_v28, %v432_v24  ;;  %v1603_v24 = vpack.c.bf16 %v758_v21, %v757_v18  ;;  %v1040_v18 = vld [vmem:[#allocation2 + $0x3a8] sm:$0xff] }
 0x46a   :  { %v342_v37 = vpop.xlane.xlu1 %341 }
 0x46b   :  { %1704 = vrcp.f32 %v342_v37  ;;  %v452_v37 = vld [vmem:[#allocation2 + $0x1f0] sm:$0xff] }
 0x46c   :  { %v1529_v41 = vpack.c.bf16 %v453_v40, %v452_v37  ;;  %v762_v37 = vld [vmem:[#allocation2 + $0x238] sm:$0xff]  ;;  %v779_v40 = vld [vmem:[#allocation2 + $0x2c0] sm:$0xff] }
 0x475   :  { %v1705_v46 = vpop.eup %1704 }
 0x476   :  { %v344_v50 = vmul.f32 %v1705_v46, %v1703_v29  ;;  %v450_v29 = vld [vmem:[#allocation2 + $0x1e0] sm:$0xff]  ;;  %v1531_v46 = vpack.c.bf16 %v437_v43, %v436_v42 }
 0x477   :  { %v1525_v30 = vpack.c.bf16 %v451_v25, %v450_v29  ;;  %v759_v29 = vld [vmem:[#allocation2 + $0x220] sm:$0xff]  ;;  %v760_v25 = vld [vmem:[#allocation2 + $0x228] sm:$0xff] }
 0x478   :  { %1149 = vmatmul.mubr.msk.f32.vlgmr.msra.gmra.mrb[4].mxu1 %vm139_vm0, %v344_v50  ;;  %v1607_v34 = vpack.c.bf16 %v760_v25, %v759_v29  ;;  %v1025_v29 = vld [vmem:[#allocation2 + $0x330] sm:$0xff]  ;;  %v1026_v25 = vld [vmem:[#allocation2 + $0x338] sm:$0xff] }
 0x479   :  { %1504 = vmatpush3.bf16.msra.mxu1 %v1503_v47 }
 0x47a   :  { %1506 = vmatprep.subr.bf16.mxu1 %v1505_v51 }
 0x47d   :  { %1508 = vmatpush3.bf16.msra.mxu1 %v1507_v56 }
 0x47e   :  { %1510 = vmatprep.subr.bf16.mxu1 %v1509_v58 }
 0x481   :  { %1512 = vmatpush3.bf16.msra.mxu1 %v1511_v4  ;;  %v1597_v4 = vpack.c.bf16 %v772_v2, %v771_v0 }
 0x482   :  { %1514 = vmatprep.subr.bf16.mxu1 %v1513_v5 }
 0x483   :  { %1598 = vmatprep.subr.bf16.mxu0 %v1597_v4 }
 0x485   :  { %1516 = vmatpush3.bf16.msra.mxu1 %v1515_v12 }
 0x486   :  { %1518 = vmatprep.subr.bf16.mxu1 %v1517_v15  ;;  %v1599_v15 = vpack.c.bf16 %v756_v9, %v755_v6  ;;  %v1019_v6 = vld [vmem:[#allocation2 + $0x300] sm:$0xff]  ;;  %v1020_v9 = vld [vmem:[#allocation2 + $0x308] sm:$0xff] }
 0x489   :  { %1520 = vmatpush3.bf16.msra.mxu1 %v1519_v22  ;;  %v775_v22 = vld [vmem:[#allocation2 + $0x2a0] sm:$0xff] }
 0x48a   :  { %1522 = vmatprep.subr.bf16.mxu1 %v1521_v23  ;;  %v776_v23 = vld [vmem:[#allocation2 + $0x2a8] sm:$0xff] }
 0x48b   :  { %v1605_v28 = vpack.c.bf16 %v776_v23, %v775_v22  ;;  %v1023_v23 = vld [vmem:[#allocation2 + $0x320] sm:$0xff] }
 0x48d   :  { %1524 = vmatpush3.bf16.msra.mxu1 %v1523_v49  ;;  %v777_v49 = vld [vmem:[#allocation2 + $0x2b0] sm:$0xff] }
 0x48e   :  { %1526 = vmatprep.subr.bf16.mxu1 %v1525_v30  ;;  %v778_v30 = vld [vmem:[#allocation2 + $0x2b8] sm:$0xff] }
 0x48f   :  { %v1609_v35 = vpack.c.bf16 %v778_v30, %v777_v49  ;;  %v1043_v49 = vld [vmem:[#allocation2 + $0x3c0] sm:$0xff]  ;;  %v1044_v30 = vld [vmem:[#allocation2 + $0x3c8] sm:$0xff] }
 0x491   :  { %1528 = vmatpush3.bf16.msra.mxu1 %v1527_v36  ;;  %v761_v36 = vld [vmem:[#allocation2 + $0x230] sm:$0xff] }
 0x492   :  { %1530 = vmatprep.subr.bf16.mxu1 %v1529_v41  ;;  %v780_v41 = vld [vmem:[#allocation2 + $0x2c8] sm:$0xff]  ;;  %v1611_v42 = vpack.c.bf16 %v762_v37, %v761_v36  ;;  %v1027_v36 = vld [vmem:[#allocation2 + $0x340] sm:$0xff] }
 0x493   :  { %v1613_v43 = vpack.c.bf16 %v780_v41, %v779_v40  ;;  %v1028_v37 = vld [vmem:[#allocation2 + $0x348] sm:$0xff]  ;;  %v1045_v40 = vld [vmem:[#allocation2 + $0x3d0] sm:$0xff]  ;;  %v1046_v41 = vld [vmem:[#allocation2 + $0x3d8] sm:$0xff] }
 0x495   :  { %1532 = vmatpush3.bf16.msra.mxu1 %v1531_v46  ;;  %v763_v46 = vld [vmem:[#allocation2 + $0x240] sm:$0xff] }
 0x496   :  { %1566 = vmatprep.subr.bf16.mxu1 %v1818_v3 }
 0x54b   :  { %v414_v47 = vpop.f32.mrb[4].mxu1 }
 0x54c   :  { %v416_v50 = vpop.f32.mrb[5].mxu1  ;;  %v419_v52 = vmul.f32 %v2010_v57, %v414_v47  ;;  %v2059_v57 = vld [vmem:[%s2120_s0 + $0x38] sm:$0xff]  ;;  %v764_v47 = vld [vmem:[#allocation2 + $0x248] sm:$0xff] }
 0x54d   :  { %v420_v51 = vmul.f32 %v1988_v1, %v416_v50  ;;  %v2053_v1 = vld [vmem:[%s2120_s0 + $0x20] sm:$0xff]  ;;  %v781_v50 = vld [vmem:[#allocation2 + $0x2d0] sm:$0xff] }
 0x54f   :  { %518 = vmatprep.mubr.f32.mxu1 %v420_v51  ;;  %v782_v51 = vld [vmem:[#allocation2 + $0x2d8] sm:$0xff] }
 0x550   :  { %519 = vmatmul.mubr.f32.vlgmr.msra.gmra.mrb[6].mxu1 %v419_v52  ;;  %v1615_v52 = vpack.c.bf16 %v764_v47, %v763_v46  ;;  %v1029_v46 = vld [vmem:[#allocation2 + $0x350] sm:$0xff]  ;;  %v1030_v47 = vld [vmem:[#allocation2 + $0x358] sm:$0xff] }
 0x551   :  { %1568 = vmatpush3.bf16.msra.mxu1 %v1829_v7  ;;  %661 = vmatprep.mubr.f32.mxu1 %v2032_v53 }
 0x552   :  { %1570 = vmatprep.subr.bf16.mxu1 %v1831_v8 }
 0x555   :  { %1572 = vmatpush3.bf16.msra.mxu1 %v1847_v13 }
 0x556   :  { %1574 = vmatprep.subr.bf16.mxu1 %v1850_v14 }
 0x559   :  { %1576 = vmatpush3.bf16.msra.mxu1 %v1865_v19 }
 0x55a   :  { %1578 = vmatprep.subr.bf16.mxu1 %v1868_v20 }
 0x55d   :  { %1580 = vmatpush3.bf16.msra.mxu1 %v1889_v26 }
 0x55e   :  { %1582 = vmatprep.subr.bf16.mxu1 %v1892_v27 }
 0x561   :  { %1584 = vmatpush3.bf16.msra.mxu1 %v1907_v32 }
 0x562   :  { %1586 = vmatprep.subr.bf16.mxu1 %v1910_v33 }
 0x565   :  { %1588 = vmatpush3.bf16.msra.mxu1 %v1925_v38 }
 0x566   :  { %1590 = vmatprep.subr.bf16.mxu1 %v1928_v39 }
 0x569   :  { %1592 = vmatpush3.bf16.msra.mxu1 %v1943_v44 }
 0x56a   :  { %1594 = vmatprep.subr.bf16.mxu1 %v1946_v45 }
 0x56d   :  { %1596 = vmatpush3.bf16.msra.mxu1 %v1955_v48 }
 0x56e   :  { %1630 = vmatprep.subr.bf16.mxu1 %v1818_v3  ;;  %v2081_v3 = vld [vmem:[%s2120_s0 + $0x30] sm:$0xff] }
 0x570   :  { %662 = vmatmul.mubr.f32.vlgmr.msra.gmra.mrb[8].mxu1 %v2053_v1 }
 0x571   :  { %1632 = vmatpush3.bf16.msra.mxu1 %v1829_v7  ;;  %925 = vmatprep.mubr.f32.mxu1 %v2059_v57 }
 0x572   :  { %1634 = vmatprep.subr.bf16.mxu1 %v1831_v8 }
 0x575   :  { %1636 = vmatpush3.bf16.msra.mxu1 %v1847_v13 }
 0x576   :  { %1638 = vmatprep.subr.bf16.mxu1 %v1850_v14 }
 0x579   :  { %1640 = vmatpush3.bf16.msra.mxu1 %v1865_v19 }
 0x57a   :  { %1642 = vmatprep.subr.bf16.mxu1 %v1868_v20 }
 0x57d   :  { %1644 = vmatpush3.bf16.msra.mxu1 %v1889_v26 }
 0x57e   :  { %1646 = vmatprep.subr.bf16.mxu1 %v1892_v27 }
 0x581   :  { %1648 = vmatpush3.bf16.msra.mxu1 %v1907_v32 }
 0x582   :  { %1650 = vmatprep.subr.bf16.mxu1 %v1910_v33 }
 0x585   :  { %1652 = vmatpush3.bf16.msra.mxu1 %v1925_v38 }
 0x586   :  { %1654 = vmatprep.subr.bf16.mxu1 %v1928_v39 }
 0x589   :  { %1656 = vmatpush3.bf16.msra.mxu1 %v1943_v44 }
 0x58a   :  { %1658 = vmatprep.subr.bf16.mxu1 %v1946_v45 }
 0x58d   :  { %1660 = vmatpush3.bf16.msra.mxu1 %v1955_v48 }
 0x590   :  { %926 = vmatmul.mubr.f32.vlgmr.msra.gmra.mrb[10].mxu1 %v2081_v3 }
 0x623   :  { %v1259_v7 = vpop.f32.mrb[6].mxu1 }
 0x624   :  { %v1260_v8 = vpop.f32.mrb[7].mxu1 }
 0x625   :  { %v1261_v13 = vadd.f32 %v1260_v8, %v1259_v7  ;;  %v1617_v7 = vpack.c.bf16 %v782_v51, %v781_v50  ;;  %v765_v8 = vld [vmem:[#allocation2 + $0x250] sm:$0xff]  ;;  %v1683_v50 = vpack.c.bf16 %v1030_v47, %v1029_v46  ;;  %v1047_v51 = vld [vmem:[#allocation2 + $0x3e0] sm:$0xff] }
 0x627   :  { %v2085_v14 = vadd.f32 %v2023_v31, %v1261_v13  ;;  %v766_v13 = vld [vmem:[#allocation2 + $0x258] sm:$0xff] }
 0x643   :  { %v1329_v19 = vpop.f32.mrb[8].mxu1 }
 0x644   :  { %v1330_v20 = vpop.f32.mrb[9].mxu1 }
 0x645   :  { %v1331_v26 = vadd.f32 %v1330_v20, %v1329_v19  ;;  %v783_v19 = vld [vmem:[#allocation2 + $0x2e0] sm:$0xff]  ;;  %v784_v20 = vld [vmem:[#allocation2 + $0x2e8] sm:$0xff] }
 0x647   :  { %v667_v27 = vsel %vm139_vm0, %v1331_v26, -inf }
 0x648   :  { %668 = vmax.xlane.f32.xlu0 %v667_v27  ;;  %v1621_v27 = vpack.c.bf16 %v784_v20, %v783_v19  ;;  %v1049_v20 = vld [vmem:[#allocation2 + $0x3f0] sm:$0xff] }
 0x663   :  { %v1399_v32 = vpop.f32.mrb[10].mxu1 }
 0x664   :  { %v1400_v33 = vpop.f32.mrb[11].mxu1 }
 0x665   :  { %v1401_v38 = vadd.f32 %v1400_v33, %v1399_v32  ;;  %v767_v32 = vld [vmem:[#allocation2 + $0x260] sm:$0xff]  ;;  %v768_v33 = vld [vmem:[#allocation2 + $0x268] sm:$0xff] }
 0x667   :  { %v931_v39 = vsel %vm139_vm0, %v1401_v38, -inf }
 0x668   :  { %932 = vmax.xlane.f32.xlu0 %v931_v39  ;;  %v785_v39 = vld [vmem:[#allocation2 + $0x2f0] sm:$0xff] }
 0x6d5   :  { %v669_v44 = vpop.xlane.xlu0 %668 }
 0x6d6   :  { %v670_v45 = vsub.f32 %v1331_v26, %v669_v44  ;;  %v1619_v26 = vpack.c.bf16 %v766_v13, %v765_v8  ;;  %v786_v44 = vld [vmem:[#allocation2 + $0x2f8] sm:$0xff]  ;;  %v1031_v8 = vld [vmem:[#allocation2 + $0x360] sm:$0xff]  ;;  %v1032_v13 = vld [vmem:[#allocation2 + $0x368] sm:$0xff] }
 0x6d7   :  { %v1687_v19 = vpack.c.bf16 %v1032_v13, %v1031_v8 }
 0x6d8   :  { %v671_v48 = vmul.f32 1.442695, %v670_v45  ;;  %v1625_v45 = vpack.c.bf16 %v786_v44, %v785_v39 }
 0x6da   :  { %1706 = vpow2.f32 %v671_v48  ;;  %v769_v48 = vld [vmem:[#allocation2 + $0x270] sm:$0xff] }
 0x6e4   :  { %v1707_v54 = vpop.eup %1706 }
 0x6e5   :  { %v673_v31 = vsel %vm139_vm0, %v1707_v54, 0.0 }
 0x6e6   :  { %674 = vadd.xlane.f32.xlu1 %v673_v31 }
 0x6f5   :  { %v933_v55 = vpop.xlane.xlu0 %932 }
 0x6f6   :  { %v934_v56 = vsub.f32 %v1401_v38, %v933_v55  ;;  %v1623_v38 = vpack.c.bf16 %v768_v33, %v767_v32  ;;  %v1033_v32 = vld [vmem:[#allocation2 + $0x370] sm:$0xff]  ;;  %v1034_v33 = vld [vmem:[#allocation2 + $0x378] sm:$0xff] }
 0x6f8   :  { %v935_v58 = vmul.f32 1.442695, %v934_v56 }
 0x6fa   :  { %1708 = vpow2.f32 %v935_v58  ;;  %v1035_v58 = vld [vmem:[#allocation2 + $0x380] sm:$0xff] }
 0x704   :  { %v2090_v62 = vpop.eup %1708 }
 0x705   :  { %v937_v63 = vsel %vm139_vm0, %v2090_v62, 0.0 }
 0x706   :  { %938 = vadd.xlane.f32.xlu1 %v937_v63  ;;  %v1036_v63 = vld [vmem:[#allocation2 + $0x388] sm:$0xff] }
 0x773   :  { %v675_v5 = vpop.xlane.xlu1 %674 }
 0x774   :  { %1710 = vrcp.f32 %v675_v5  ;;  %v1661_v5 = vpack.c.bf16 %v1036_v63, %v1035_v58 }
 0x77e   :  { %v1711_v12 = vpop.eup %1710 }
 0x77f   :  { %v677_v16 = vmul.f32 %v1711_v12, %v1707_v54  ;;  %v770_v54 = vld [vmem:[#allocation2 + $0x278] sm:$0xff] }
 0x780   :  { %v1627_v31 = vpack.c.bf16 %v770_v54, %v769_v48  ;;  %v1038_v12 = vld [vmem:[#allocation2 + $0x398] sm:$0xff] }
 0x781   :  { %1152 = vmatmul.mubr.msk.f32.vlgmr.msra.gmra.mrb[4].mxu0 %vm139_vm0, %v677_v16  ;;  %v1665_v16 = vpack.c.bf16 %v1038_v12, %v1037_v11 }
 0x782   :  { %1600 = vmatpush3.bf16.msra.mxu0 %v1599_v15 }
 0x783   :  { %1602 = vmatprep.subr.bf16.mxu0 %v1601_v17  ;;  %v1022_v17 = vld [vmem:[#allocation2 + $0x318] sm:$0xff] }
 0x786   :  { %1604 = vmatpush3.bf16.msra.mxu0 %v1603_v24  ;;  %v1024_v24 = vld [vmem:[#allocation2 + $0x328] sm:$0xff] }
 0x787   :  { %1606 = vmatprep.subr.bf16.mxu0 %v1605_v28  ;;  %v1042_v28 = vld [vmem:[#allocation2 + $0x3b8] sm:$0xff] }
 0x78a   :  { %1608 = vmatpush3.bf16.msra.mxu0 %v1607_v34  ;;  %v1675_v34 = vpack.c.bf16 %v1026_v25, %v1025_v29 }
 0x78b   :  { %1610 = vmatprep.subr.bf16.mxu0 %v1609_v35  ;;  %v1677_v35 = vpack.c.bf16 %v1044_v30, %v1043_v49 }
 0x78e   :  { %1612 = vmatpush3.bf16.msra.mxu0 %v1611_v42  ;;  %v1679_v42 = vpack.c.bf16 %v1028_v37, %v1027_v36 }
 0x78f   :  { %1614 = vmatprep.subr.bf16.mxu0 %v1613_v43  ;;  %v1681_v43 = vpack.c.bf16 %v1046_v41, %v1045_v40 }
 0x792   :  { %1616 = vmatpush3.bf16.msra.mxu0 %v1615_v52  ;;  %v1048_v52 = vld [vmem:[#allocation2 + $0x3e8] sm:$0xff] }
 0x793   :  { %1618 = vmatprep.subr.bf16.mxu0 %v1617_v7  ;;  %v939_v55 = vpop.xlane.xlu1 %938  ;;  %v1685_v7 = vpack.c.bf16 %v1048_v52, %v1047_v51 }
 0x794   :  { %1712 = vrcp.f32 %v939_v55 }
 0x796   :  { %1620 = vmatpush3.bf16.msra.mxu0 %v1619_v26  ;;  %v1050_v26 = vld [vmem:[#allocation2 + $0x3f8] sm:$0xff] }
 0x797   :  { %1622 = vmatprep.subr.bf16.mxu0 %v1621_v27  ;;  %v1689_v27 = vpack.c.bf16 %v1050_v26, %v1049_v20 }
 0x79a   :  { %1624 = vmatpush3.bf16.msra.mxu0 %v1623_v38  ;;  %v1691_v38 = vpack.c.bf16 %v1034_v33, %v1033_v32 }
 0x79b   :  { %1626 = vmatprep.subr.bf16.mxu0 %v1625_v45 }
 0x79e   :  { %1628 = vmatpush3.bf16.msra.mxu0 %v1627_v31  ;;  %v1713_v10 = vpop.eup %1712 }
 0x79f   :  { %945 = vmatprep.subr.mxu0 %v1973_v59  ;;  %v1663_v59 = vpack.c.bf16 %v1020_v9, %v1019_v6  ;;  %v941_v15 = vmul.f32 %v1713_v10, %v2090_v62 }
 0x854   :  { %v747_v56 = vpop.f32.mrb[4].mxu0 }
 0x855   :  { %v749_v0 = vpop.f32.mrb[5].mxu0  ;;  %v752_v4 = vmul.f32 %v2053_v1, %v747_v56  ;;  %v1039_v1 = vld [vmem:[#allocation2 + $0x3a0] sm:$0xff] }
 0x856   :  { %v753_v2 = vmul.f32 %v2032_v53, %v749_v0  ;;  %v1021_v53 = vld [vmem:[#allocation2 + $0x310] sm:$0xff]  ;;  %v1669_v22 = vpack.c.bf16 %v1040_v18, %v1039_v1 }
 0x857   :  { %v1667_v21 = vpack.c.bf16 %v1022_v17, %v1021_v53 }
 0x858   :  { %851 = vmatprep.mubr.f32.mxu0 %v753_v2  ;;  %v1156_v2 = vld [vmem:[%s2124_s4] ss:$0 sm:$0xff] }
 0x859   :  { %852 = vmatmul.mubr.f32.vlgmr.msra.gmra.mrb[6].mxu0 %v752_v4 }
 0x85a   :  { %946 = vmatpush1.msra.mxu0 %v1978_v60  ;;  %1009 = vmatprep.mubr.f32.mxu0 %v1765_v61  ;;  %v1041_v60 = vld [vmem:[#allocation2 + $0x3b0] sm:$0xff]  ;;  %v1671_v61 = vpack.c.bf16 %v1024_v24, %v1023_v23 }
 0x85b   :  { %1662 = vmatprep.subr.bf16.mxu0 %v1661_v5  ;;  %v1673_v62 = vpack.c.bf16 %v1042_v28, %v1041_v60 }
 0x85d   :  { %1155 = vmatmul.mubr.msk.f32.vlgmr.msra.gmra.mrb[8].mxu0 %vm139_vm0, %v941_v15 }
 0x85e   :  { %1664 = vmatpush3.bf16.msra.mxu0 %v1663_v59 }
 0x85f   :  { %1666 = vmatprep.subr.bf16.mxu0 %v1665_v16 }
 0x862   :  { %1668 = vmatpush3.bf16.msra.mxu0 %v1667_v21 }
 0x863   :  { %1670 = vmatprep.subr.bf16.mxu0 %v1669_v22 }
 0x866   :  { %1672 = vmatpush3.bf16.msra.mxu0 %v1671_v61 }
 0x867   :  { %1674 = vmatprep.subr.bf16.mxu0 %v1673_v62 }
 0x86a   :  { %1676 = vmatpush3.bf16.msra.mxu0 %v1675_v34 }
 0x86b   :  { %1678 = vmatprep.subr.bf16.mxu0 %v1677_v35 }
 0x86e   :  { %1680 = vmatpush3.bf16.msra.mxu0 %v1679_v42 }
 0x86f   :  { %1682 = vmatprep.subr.bf16.mxu0 %v1681_v43 }
 0x872   :  { %1684 = vmatpush3.bf16.msra.mxu0 %v1683_v50 }
 0x873   :  { %1686 = vmatprep.subr.bf16.mxu0 %v1685_v7 }
 0x876   :  { %1688 = vmatpush3.bf16.msra.mxu0 %v1687_v19 }
 0x877   :  { %1690 = vmatprep.subr.bf16.mxu0 %v1689_v27 }
 0x87a   :  { %1692 = vmatpush3.bf16.msra.mxu0 %v1691_v38 }
 0x92c   :  { %v1364_v39 = vpop.f32.mrb[6].mxu0 }
 0x92d   :  { %v1365_v44 = vpop.f32.mrb[7].mxu0 }
 0x92e   :  { %v1366_v45 = vadd.f32 %v1365_v44, %v1364_v39 }
 0x930   :  { %v857_v48 = vadd.f32 %v1366_v45, %v2085_v14  ;;  %v1011_v54 = vpop.f32.mrb[8].mxu0 }
 0x931   :  { %v1013_v31 = vpop.f32.mrb[9].mxu0  ;;  %v1016_v56 = vmul.f32 %v2081_v3, %v1011_v54 }
 0x932   :  { %v1017_v55 = vmul.f32 %v2059_v57, %v1013_v31 }
 0x934   :  { %1115 = vmatprep.mubr.f32.mxu0 %v1017_v55 }
 0x935   :  { %1116 = vmatmul.mubr.f32.vlgmr.msra.gmra.mrb[10].mxu0 %v1016_v56 }
 0xa08   :  { %v1434_v58 = vpop.f32.mrb[10].mxu0 }
 0xa09   :  { %v1435_v63 = vpop.f32.mrb[11].mxu0 }
 0xa0a   :  { %v1436_v0 = vadd.f32 %v1435_v63, %v1434_v58 }
 0xa0c   :  { %v1121_v4 = vadd.f32 %v1436_v0, %v857_v48 }
 0xa0e   :  { %v1129_v5 = vadd.f32 %v1156_v2, %v1121_v4 }
 0xa10   :  { %1130 = vst [vmem:[#allocation5] sm:$0xff] %v1129_v5 }
 0xa11   :  { %1747 = shalt.err (!%p1744_p12)
}
 0xa12   :  { %s1748_s16 = scalar_lea.hbm %s2125_s5, 128 }
 0xa13   :  { %p1749_p13 = scmp.ne.s32.totalorder %s2125_s5, %s1748_s16  ;;  %p1752_p0 = scmp.lt.u32.totalorder %s1748_s16, %s2125_s5 }
 0xa15   :  { %p1754_p1 = pnand %p1752_p0, %p1749_p13 }
 0xa17   :  { %1757 = shalt.err (!%p1754_p1)
}
 0xa18   :  { %1140 = dma.vmem_to_hbm [thread:$0]  %s1138_s13, 128, %s2125_s5, [#allocation4]  }
 0xa19   :  { %1760 = dma.done.wait [#allocation4], 128  }
 0xa1a   :  { %1761 = vsyncadd [#allocation4], 4294967168 }
 0xa1b   :  { %1144 = vsyncpa [#allocation3], 1 }
 0xa1c   :  { %1145 = vsyncpa [#allocation4], 1 }

</bundles_post_ra>
